<compile_context>
chip_gen: v6e
topology: v6e:2x2x1
jax: 0.10.0
libtpu: 0.0.40
codegen_flags: <defaults>
</compile_context>

<pallas_src>
import jax
import jax.numpy as jnp
from jax.experimental import pallas as pl
from jax.experimental.pallas import tpu as pltpu


def _tanh_kernel(x_ref, o_ref):
    # -tanh(-x) == tanh(x): one EUP transcendental per element, no extra VPU ops
    o_ref[...] = jnp.tanh(x_ref[...])


def trans_layer_rule18(x: jax.Array, *, target_block_bytes: int = 2 << 20) -> jax.Array:
    """Computes -tanh(-x) (== tanh(x)) elementwise with a Pallas TPU kernel."""
    orig_shape = x.shape
    dtype = x.dtype
    n = int(x.size)
    itemsize = jnp.dtype(dtype).itemsize

    # Sublane packing multiple: 8 for 32-bit, 16 for 16-bit, 32 for 8-bit dtypes.
    sub_mult = max(8, 32 // max(itemsize, 1))

    # Pick the lane (last-dim) width: widest multiple of 128 that divides n
    # exactly, preferring candidates whose resulting row count is a multiple of
    # the sublane packing (dense vreg tiles).  Fall back to 128 + tail padding.
    lane_candidates = (2048, 1024, 512, 256, 128)
    lanes = None
    for cand in lane_candidates:
        if n % cand == 0 and (n // cand) % sub_mult == 0:
            lanes = cand
            break
    if lanes is None:
        for cand in lane_candidates:
            if n % cand == 0:
                lanes = cand
                break
    if lanes is None:
        lanes = 128

    rows_unpadded = (n + lanes - 1) // lanes

    # Roofline-sized tile: ~target_block_bytes per buffer, rounded down to the
    # sublane packing multiple (never below one packed tile of rows).
    target_rows = max(
        sub_mult,
        (target_block_bytes // (lanes * itemsize)) // sub_mult * sub_mult,
    )

    if rows_unpadded <= target_rows:
        # Single block covering the whole array: block shape == full array
        # dims, so the (8,128) divisibility rule is satisfied by exemption.
        tile_rows = rows_unpadded
        rows = rows_unpadded
    else:
        tile_rows = target_rows
        rows = ((rows_unpadded + tile_rows - 1) // tile_rows) * tile_rows

    n_pad = rows * lanes
    x_flat = jnp.ravel(x)
    if n_pad != n:
        x_flat = jnp.pad(x_flat, (0, n_pad - n))
    x2d = x_flat.reshape(rows, lanes)

    grid = (rows // tile_rows,)
    out2d = pl.pallas_call(
        _tanh_kernel,
        out_shape=jax.ShapeDtypeStruct((rows, lanes), dtype),
        grid_spec=pltpu.PrefetchScalarGridSpec(
            num_scalar_prefetch=0,
            grid=grid,
            in_specs=[pl.BlockSpec((tile_rows, lanes), lambda i: (i, 0))],
            out_specs=pl.BlockSpec((tile_rows, lanes), lambda i: (i, 0)),
        ),
        compiler_params=pltpu.CompilerParams(
            dimension_semantics=("parallel",),
        ),
        cost_estimate=pl.CostEstimate(
            flops=0,
            transcendentals=n,
            bytes_accessed=2 * n_pad * itemsize,
        ),
    )(x2d)

    out_flat = out2d.reshape(-1)
    if n_pad != n:
        out_flat = out_flat[:n]
    return out_flat.reshape(orig_shape)


if __name__ == "__main__":
    key = jax.random.PRNGKey(0)
    # small NCHW input consistent with the module: batch=2, C=4, 16x16
    x = jax.random.normal(key, (2, 4, 16, 16), dtype=jnp.float32)

    out = jax.block_until_ready(trans_layer_rule18(x))

    # reference: -tanh(-x)
    ref = -jnp.tanh(-x)
    assert out.shape == x.shape and out.dtype == x.dtype
    assert jnp.allclose(out, ref, atol=1e-6, rtol=1e-6)

    print("KERNEL_OK")
</pallas_src>

<mosaic_0001>
module attributes {stable_mosaic.version = 11 : i64} {
  func.func @_tanh_kernel(%arg0: i32, %arg1: memref<8x256xf32, #tpu.memory_space<vmem>>, %arg2: memref<8x256xf32, #tpu.memory_space<vmem>>) attributes {dimension_semantics = [#tpu.dimension_semantics<parallel>], iteration_bounds = array<i64: 1>, scalar_prefetch = 0 : i64, scratch_operands = 0 : i64, tpu.core_type = #tpu.core_type<tc>, window_params = [{transform_indices = @transform_0, window_bounds = array<i64: 8, 256>}, {transform_indices = @transform_1, window_bounds = array<i64: 8, 256>}]} {
    %c0 = arith.constant 0 : index
    %c0_0 = arith.constant 0 : index
    %0 = vector.load %arg1[%c0, %c0_0] : memref<8x256xf32, #tpu.memory_space<vmem>>, vector<8x256xf32>
    %1 = math.tanh %0 : vector<8x256xf32>
    %c0_1 = arith.constant 0 : index
    %c0_2 = arith.constant 0 : index
    %2 = vector.load %arg2[%c0_1, %c0_2] : memref<8x256xf32, #tpu.memory_space<vmem>>, vector<8x256xf32>
    tpu.vector_store %arg2[%c0_1, %c0_2], %1 {strides = array<i32>} : memref<8x256xf32, #tpu.memory_space<vmem>>, vector<8x256xf32>,
    return
  }
  func.func @transform_0(%arg0: i32) -> (i32, i32) {
    %c0_i32 = arith.constant 0 : i32
    %c0_i32_0 = arith.constant 0 : i32
    return %arg0, %c0_i32 : i32, i32
  }
  func.func @transform_1(%arg0: i32) -> (i32, i32) {
    %c0_i32 = arith.constant 0 : i32
    %c0_i32_0 = arith.constant 0 : i32
    return %arg0, %c0_i32 : i32, i32
  }
}

</mosaic_0001>

<bundles_post_ra>
// kernel: tpu_custom_call.1
= control target key start
LH: loop header
LB: loop body
LE: loop exit
PB: predicated region body
PF: predicated region fallthrough
CT: control target
= control target key end

     0   :  { %6 = vsyncpa [#allocation3], 0  ;;  %s110_s0 = inlined_call_operand.hbm [shape: f32[8,256], index: 0, kind: input, shape index: {}]   ;;  %s111_s1 = inlined_call_operand.hbm [shape: f32[8,256], index: 1, kind: output, shape index: {}]  }
   0x1   :  { %7 = vsyncpa [#allocation4], 0  ;;  %s92_s6 = smov [#allocation2]  }
   0x2   :  { %s14_s7 = sshll.u32 %s92_s6, 4  ;;  %s15_s7 = int_to_ptr.vmem [resolvable:$true] %s14_s7 }
   0x3   :  { %s56_s8 = scalar_lea.vmem %s15_s7, 256  ;;  %p61_p1 = scmp.lt.s32.totalorder %s15_s7, %s15_s7 }
   0x4   :  { %p57_p0 = scmp.ne.s32.totalorder %s15_s7, %s56_s8  ;;  %p62_p2 = scmp.lt.s32.totalorder %s56_s8, %s56_s8 }
   0x6   :  { %p63_p3 = por %p62_p2, %p61_p1 }
   0x8   :  { %p64_p4 = pnand %p63_p3, %p57_p0 }
   0xa   :  { %67 = shalt.err (!%p64_p4)
}
   0xb   :  { %17 = dma.hbm_to_vmem [thread:$0]  %s110_s0, 256, %s15_s7, [#allocation3]  }
   0xc   :  { %88 = dma.done.wait [#allocation3], 256  }
   0xd   :  { %89 = vsyncadd [#allocation3], 4294967040  ;;  %v21_v0 = vld [vmem:[#allocation2] sm:$0xff]  ;;  %v22_v1 = vld [vmem:[#allocation2 + $0x8] sm:$0xff]  ;;  %s93_s11 = smov [#allocation5]  }
   0xe   :  { %44 = vtanh.f32 %v21_v0  ;;  %s33_s12 = sshll.u32 %s93_s11, 4  ;;  %s34_s12 = int_to_ptr.vmem [resolvable:$true] %s33_s12 }
   0xf   :  { %46 = vtanh.f32 %v22_v1  ;;  %s68_s13 = scalar_lea.vmem %s34_s12, 256  ;;  %p73_p6 = scmp.lt.s32.totalorder %s34_s12, %s34_s12 }
  0x10   :  { %p69_p5 = scmp.ne.s32.totalorder %s34_s12, %s68_s13  ;;  %p74_p7 = scmp.lt.s32.totalorder %s68_s13, %s68_s13 }
  0x12   :  { %p75_p8 = por %p74_p7, %p73_p6 }
  0x14   :  { %p76_p9 = pnand %p75_p8, %p69_p5 }
  0x1b   :  { %v45_v2 = vpop.eup %44 }
  0x1c   :  { %v47_v3 = vpop.eup %46  ;;  %25 = vst [vmem:[#allocation5] sm:$0xff] %v45_v2 }
  0x1d   :  { %26 = vst [vmem:[#allocation5 + $0x8] sm:$0xff] %v47_v3 }
  0x1e   :  { %79 = shalt.err (!%p76_p9)
}
  0x1f   :  { %36 = dma.vmem_to_hbm [thread:$0]  %s34_s12, 256, %s111_s1, [#allocation4]  }
  0x20   :  { %90 = dma.done.wait [#allocation4], 256  }
  0x21   :  { %91 = vsyncadd [#allocation4], 4294967040 }
  0x22   :  { %40 = vsyncpa [#allocation3], 1 }
  0x23   :  { %41 = vsyncpa [#allocation4], 1 }

</bundles_post_ra>
